<compile_context>
chip_gen: v6e
topology: v6e:2x2x1
jax: 0.10.0
libtpu: 0.0.40
codegen_flags: <defaults>
</compile_context>

<pallas_src>
import functools
from typing import Iterable, List, Tuple

import jax
import jax.numpy as jnp
from jax.experimental import pallas as pl
from jax.experimental.pallas import tpu as pltpu


# ----------------------------------------------------------------------------
# Clock-cycle schedule (identical to the PyTorch _clock_cycles).  The fused
# kernel below executes the same math (each micro-batch visits partitions
# 0..P-1 in order); on a single TensorCore the schedule itself buys nothing,
# so it is kept only for semantic fidelity / validation.
# ----------------------------------------------------------------------------
def _clock_cycles(num_batches: int, num_partitions: int) -> Iterable[List[Tuple[int, int]]]:
    total_cycles = num_batches + num_partitions - 1
    for clock in range(total_cycles):
        tasks = []
        for microbatch in range(num_batches):
            partition = clock - microbatch
            if 0 <= partition < num_partitions:
                tasks.append((microbatch, partition))
        yield tasks


# ----------------------------------------------------------------------------
# Fused Pallas kernel: one grid step = one micro-batch through ALL partitions.
#   x_ref : (mb, d_in)          VMEM   (micro-batch tile)
#   w_ref : (P, d_in, d_out)    VMEM   (all transposed weights, resident)
#   b_ref : (P, 1, d_out)       VMEM   (all biases, resident)
#   o_ref : (mb, d_out)         VMEM
# The partition loop is a static Python unroll (P is small and known at
# trace time) so weight indexing is static and the activation stays in
# registers/VMEM in f32 between partitions.
# ----------------------------------------------------------------------------
def _make_pipeline_kernel(num_partitions: int):
    def kernel(x_ref, w_ref, b_ref, o_ref):
        act = x_ref[...].astype(jnp.float32)
        for p in range(num_partitions):
            act = jnp.dot(act, w_ref[p], preferred_element_type=jnp.float32) + b_ref[p]
        o_ref[...] = act.astype(o_ref.dtype)
    return kernel


def _fused_pipeline(x: jax.Array, w_stack: jax.Array, b_stack: jax.Array,
                    *, split_size: int) -> jax.Array:
    batch, d_in = x.shape
    num_partitions, _, d_out = w_stack.shape
    assert batch % split_size == 0, "demo keeps torch.chunk == even split"
    mb = batch // split_size
    # Alignment guarantees for lane-dense stores / unmasked MXU tiles.
    assert mb % 8 == 0 and d_in % 128 == 0 and d_out % 128 == 0, \
        "micro-batch rows must be a multiple of 8 and features of 128"
    # TODO(synk): for large hidden sizes on v7x (64 MiB VMEM), stream weight
    # K/N tiles with BlockSpec double-buffering instead of keeping the full
    # (P, d_in, d_out) stack resident, and set vmem_limit_bytes explicitly.

    return pl.pallas_call(
        _make_pipeline_kernel(num_partitions),
        out_shape=jax.ShapeDtypeStruct((batch, d_out), x.dtype),
        grid_spec=pltpu.PrefetchScalarGridSpec(
            num_scalar_prefetch=0,
            grid=(split_size,),                                   # micro-batches
            in_specs=[
                pl.BlockSpec((mb, d_in), lambda i: (i, 0)),       # x tile
                pl.BlockSpec((num_partitions, d_in, d_out),
                             lambda i: (0, 0, 0)),                # weights: same block
                pl.BlockSpec((num_partitions, 1, d_out),
                             lambda i: (0, 0, 0)),                # biases:  same block
            ],
            out_specs=pl.BlockSpec((mb, d_out), lambda i: (i, 0)),
        ),
        compiler_params=pltpu.CompilerParams(
            dimension_semantics=("parallel",)),                   # 2-TC shard on v7x
    )(x, w_stack, b_stack)


# ----------------------------------------------------------------------------
# Pipe re-implementation.
#   Per-partition device placement / worker thread queues are host-side
#   orchestration with no Pallas equivalent on a single TPU core; the
#   clock-cycle schedule degenerates into the fused in-kernel partition loop,
#   which is numerically identical.
# ----------------------------------------------------------------------------
class PipePallas:
    def __init__(self, weights: List[jax.Array], biases: List[jax.Array],
                 split_size: int = 1) -> None:
        assert len(weights) == len(biases) and len(weights) > 0
        self.split_size = int(split_size)
        # Hoisted once (not per task): transpose to (d_in, d_out) and stack.
        self.w_stack = jnp.stack([jnp.transpose(w) for w in weights], axis=0)
        self.b_stack = jnp.stack([jnp.reshape(b, (1, -1)) for b in biases], axis=0)
        # TODO(synk): per-partition device placement / worker queues have no
        # Pallas equivalent; all partitions run fused on one TensorCore.
        self._fwd = jax.jit(functools.partial(_fused_pipeline,
                                              split_size=self.split_size))

    def forward(self, x: jax.Array) -> jax.Array:
        return self._fwd(x, self.w_stack, self.b_stack)


# ----------------------------------------------------------------------------
# Main
# ----------------------------------------------------------------------------
if __name__ == "__main__":
    key = jax.random.PRNGKey(0)

    batch = 32           # -> micro-batches of 8 rows (8-sublane aligned)
    hidden = 128         # 128-lane aligned features
    split_size = 4
    num_partitions = 3   # three Linear(hidden, hidden) partitions

    k_x, *k_params = jax.random.split(key, 1 + 2 * num_partitions)
    x = jax.random.normal(k_x, (batch, hidden), dtype=jnp.float32)

    weights, biases = [], []
    for p in range(num_partitions):
        kw, kb = k_params[2 * p], k_params[2 * p + 1]
        bound = 1.0 / (hidden ** 0.5)   # PyTorch nn.Linear default init range
        weights.append(jax.random.uniform(kw, (hidden, hidden),
                                          minval=-bound, maxval=bound,
                                          dtype=jnp.float32))
        biases.append(jax.random.uniform(kb, (hidden,),
                                         minval=-bound, maxval=bound,
                                         dtype=jnp.float32))

    # Sanity: the clock-cycle schedule visits every (micro-batch, partition)
    # pair exactly once and, per micro-batch, partitions in order 0..P-1 —
    # i.e. it is equivalent to the fused sequential-per-micro-batch kernel.
    seen = [t for cyc in _clock_cycles(split_size, num_partitions) for t in cyc]
    assert sorted(seen) == [(i, j) for i in range(split_size)
                            for j in range(num_partitions)]

    pipe = PipePallas(weights, biases, split_size=split_size)
    out = pipe.forward(x)
    out = jax.block_until_ready(out)

    # Pure-JAX reference: sequential application of the partitions.
    ref = x
    for w, b in zip(weights, biases):
        ref = ref @ w.T + b
    assert out.shape == (batch, hidden)
    assert jnp.allclose(out, ref, atol=1e-4, rtol=1e-4), "mismatch vs reference"

    print("KERNEL_OK")
</pallas_src>

<mosaic_0001>
module attributes {stable_mosaic.version = 11 : i64} {
  func.func @kernel(%arg0: i32, %arg1: memref<8x128xf32, #tpu.memory_space<vmem>>, %arg2: memref<3x128x128xf32, #tpu.memory_space<vmem>>, %arg3: memref<3x1x128xf32, #tpu.memory_space<vmem>>, %arg4: memref<8x128xf32, #tpu.memory_space<vmem>>) attributes {dimension_semantics = [#tpu.dimension_semantics<parallel>], iteration_bounds = array<i64: 4>, scalar_prefetch = 0 : i64, scratch_operands = 0 : i64, tpu.core_type = #tpu.core_type<tc>, window_params = [{transform_indices = @transform_0, window_bounds = array<i64: 8, 128>}, {pipeline_mode = #tpu.pipeline_mode<synchronous>, transform_indices = @transform_1, window_bounds = array<i64: 3, 128, 128>}, {pipeline_mode = #tpu.pipeline_mode<synchronous>, transform_indices = @transform_2, window_bounds = array<i64: 3, 1, 128>}, {transform_indices = @transform_3, window_bounds = array<i64: 8, 128>}]} {
    %c0 = arith.constant 0 : index
    %c0_0 = arith.constant 0 : index
    %0 = vector.load %arg1[%c0, %c0_0] : memref<8x128xf32, #tpu.memory_space<vmem>>, vector<8x128xf32>
    %c0_1 = arith.constant 0 : index
    %c0_2 = arith.constant 0 : index
    %c0_3 = arith.constant 0 : index
    %1 = vector.load %arg2[%c0_1, %c0_2, %c0_3] : memref<3x128x128xf32, #tpu.memory_space<vmem>>, vector<1x128x128xf32>
    %2 = vector.shape_cast %1 : vector<1x128x128xf32> to vector<128x128xf32>
    %cst = arith.constant dense<0.000000e+00> : vector<8x128xf32>
    %3 = tpu.matmul %0, %2, %cst {dimension_numbers = #tpu.dot_dimension_numbers<[1], [0], [0], [1], [0, 0, 1, 1], [], []>} : vector<8x128xf32>, vector<128x128xf32>, vector<8x128xf32> -> vector<8x128xf32>
    %c0_4 = arith.constant 0 : index
    %c0_5 = arith.constant 0 : index
    %c0_6 = arith.constant 0 : index
    %4 = vector.load %arg3[%c0_4, %c0_5, %c0_6] : memref<3x1x128xf32, #tpu.memory_space<vmem>>, vector<1x1x128xf32>
    %5 = vector.shape_cast %4 : vector<1x1x128xf32> to vector<1x128xf32>
    %6 = vector.broadcast %5 : vector<1x128xf32> to vector<8x128xf32>
    %7 = arith.addf %3, %6 : vector<8x128xf32>
    %c1 = arith.constant 1 : index
    %c0_7 = arith.constant 0 : index
    %c0_8 = arith.constant 0 : index
    %8 = vector.load %arg2[%c1, %c0_7, %c0_8] : memref<3x128x128xf32, #tpu.memory_space<vmem>>, vector<1x128x128xf32>
    %9 = vector.shape_cast %8 : vector<1x128x128xf32> to vector<128x128xf32>
    %cst_9 = arith.constant dense<0.000000e+00> : vector<8x128xf32>
    %10 = tpu.matmul %7, %9, %cst_9 {dimension_numbers = #tpu.dot_dimension_numbers<[1], [0], [0], [1], [0, 0, 1, 1], [], []>} : vector<8x128xf32>, vector<128x128xf32>, vector<8x128xf32> -> vector<8x128xf32>
    %c1_10 = arith.constant 1 : index
    %c0_11 = arith.constant 0 : index
    %c0_12 = arith.constant 0 : index
    %11 = vector.load %arg3[%c1_10, %c0_11, %c0_12] : memref<3x1x128xf32, #tpu.memory_space<vmem>>, vector<1x1x128xf32>
    %12 = vector.shape_cast %11 : vector<1x1x128xf32> to vector<1x128xf32>
    %13 = vector.broadcast %12 : vector<1x128xf32> to vector<8x128xf32>
    %14 = arith.addf %10, %13 : vector<8x128xf32>
    %c2 = arith.constant 2 : index
    %c0_13 = arith.constant 0 : index
    %c0_14 = arith.constant 0 : index
    %15 = vector.load %arg2[%c2, %c0_13, %c0_14] : memref<3x128x128xf32, #tpu.memory_space<vmem>>, vector<1x128x128xf32>
    %16 = vector.shape_cast %15 : vector<1x128x128xf32> to vector<128x128xf32>
    %cst_15 = arith.constant dense<0.000000e+00> : vector<8x128xf32>
    %17 = tpu.matmul %14, %16, %cst_15 {dimension_numbers = #tpu.dot_dimension_numbers<[1], [0], [0], [1], [0, 0, 1, 1], [], []>} : vector<8x128xf32>, vector<128x128xf32>, vector<8x128xf32> -> vector<8x128xf32>
    %c2_16 = arith.constant 2 : index
    %c0_17 = arith.constant 0 : index
    %c0_18 = arith.constant 0 : index
    %18 = vector.load %arg3[%c2_16, %c0_17, %c0_18] : memref<3x1x128xf32, #tpu.memory_space<vmem>>, vector<1x1x128xf32>
    %19 = vector.shape_cast %18 : vector<1x1x128xf32> to vector<1x128xf32>
    %20 = vector.broadcast %19 : vector<1x128xf32> to vector<8x128xf32>
    %21 = arith.addf %17, %20 : vector<8x128xf32>
    %c0_19 = arith.constant 0 : index
    %c0_20 = arith.constant 0 : index
    %22 = vector.load %arg4[%c0_19, %c0_20] : memref<8x128xf32, #tpu.memory_space<vmem>>, vector<8x128xf32>
    tpu.vector_store %arg4[%c0_19, %c0_20], %21 {strides = array<i32>} : memref<8x128xf32, #tpu.memory_space<vmem>>, vector<8x128xf32>,
    return
  }
  func.func @transform_0(%arg0: i32) -> (i32, i32) {
    %c0_i32 = arith.constant 0 : i32
    %c0_i32_0 = arith.constant 0 : i32
    return %arg0, %c0_i32 : i32, i32
  }
  func.func @transform_1(%arg0: i32) -> (i32, i32, i32) {
    %c0_i32 = arith.constant 0 : i32
    %c0_i32_0 = arith.constant 0 : i32
    %c0_i32_1 = arith.constant 0 : i32
    %c0_i32_2 = arith.constant 0 : i32
    return %c0_i32, %c0_i32_0, %c0_i32_1 : i32, i32, i32
  }
  func.func @transform_2(%arg0: i32) -> (i32, i32, i32) {
    %c0_i32 = arith.constant 0 : i32
    %c0_i32_0 = arith.constant 0 : i32
    %c0_i32_1 = arith.constant 0 : i32
    %c0_i32_2 = arith.constant 0 : i32
    return %c0_i32, %c0_i32_0, %c0_i32_1 : i32, i32, i32
  }
  func.func @transform_3(%arg0: i32) -> (i32, i32) {
    %c0_i32 = arith.constant 0 : i32
    %c0_i32_0 = arith.constant 0 : i32
    return %arg0, %c0_i32 : i32, i32
  }
}

</mosaic_0001>

<bundles_post_ra>
// kernel: _fused_pipeline.1
= control target key start
LH: loop header
LB: loop body
LE: loop exit
PB: predicated region body
PF: predicated region fallthrough
CT: control target
= control target key end

     0   :  { %8 = vsyncpa [#allocation3], 0  ;;  %s1195_s0 = inlined_call_operand.hbm [shape: f32[32,128], index: 0, kind: input, shape index: {}]   ;;  %s1196_s1 = inlined_call_operand.hbm [shape: f32[3,128,128], index: 1, kind: input, shape index: {}]   ;;  %s1197_s2 = inlined_call_operand.vmem [shape: f32[3,1,128], index: 2, kind: input, shape index: {}]   ;;  %s1198_s3 = inlined_call_operand.hbm [shape: f32[32,128], index: 3, kind: output, shape index: {}]  }
   0x1   :  { %10 = vsyncpa [#allocation3 + $0x1], 0 }
   0x2   :  { %11 = vsyncpa [#allocation6], 0 }
   0x3   :  { %12 = vsyncpa [#allocation4], 0 }
   0x4   :  { %14 = vsyncpa [#allocation4 + $0x1], 0  ;;  %s967_s12 = smov 0   ;;  %s969_s13 = smov 0  }
   0x5   :  { %s971_s14 = smov 0   ;;  %s973_s15 = smov 0  }
   0x6 LB: > { %s988_s16 = sadd.s32 4294967295, %s938_s15   ;;  %s580_s17 = sadd.s32 4294967294, %s938_s15   ;;  %s938_s15 = sphi %s973_s15, %s1219_s15   ;;  %s934_s14 = sphi %s971_s14, %s1218_s14   ;;  %s930_s13 = sphi %s969_s13, %s1217_s13   ;;  %s926_s12 = sphi %s967_s12, %s1216_s12  }
   0x7   : > { %p40_p0 = scmp.ne.s32.totalorder %s930_s13, %s926_s12  ;;  %p1199_p1 = scmp.eq.s32.totalorder %s988_s16, 0 }
   0x8   : > { %p112_p3 = scmp.eq.s32.totalorder %s580_s17, 3  ;;  %p581_p5 = scmp.ge.s32.totalorder %s938_s15, 1 }
   0x9   : > { %p997_p4 = por %p1199_p1, %p40_p0  ;;  %p119_p7 = scmp.lt.s32.totalorder %s938_s15, 5 }
   0xa   : > { %p1002_p6 = por %p112_p3, %p40_p0  ;;  %s940_s21 = smov [#allocation5]  }
   0xb   : > { %s1203_s18 = scalar_select %p997_p4, 1, 0 }
   0xc   : > { %s1204_s19 = scalar_select %p1002_p6, 1, 0 }
   0xd   : > { %p1007_p8 = pnand %p581_p5, %p119_p7  ;;  %s131_s22 = sshll.u32 %s940_s21, 4  ;;  %s132_s22 = int_to_ptr.vmem [resolvable:$true] %s131_s22 }
   0xe   : > { %s1020_s24 = sadd.s32 1, %s938_s15   ;;  %s27_s25 = sadd.s32 1, %s934_s14 }
   0xf   : > { %s1205_s20 = scalar_select %p1007_p8, 1, 0 }
  0x10   : > { %p763_p9 = pneg %p1007_p8  ;;  %s24_s26 = ssub.s32 %s938_s15, %s1020_s24 }
  0x11   : > { %s827_s27 = scalar_lea.vmem %s132_s22, 6144  ;;  %p835_p3 = scmp.lt.s32.totalorder %s132_s22, %s132_s22 }
  0x12   : > { %p1015_p10 = pnand %p763_p9, %p1199_p1  ;;  %p828_p12 = scmp.ne.s32.totalorder %s132_s22, %s827_s27 }
  0x13   : > { %p836_p5 = scmp.lt.s32.totalorder %s827_s27, %s827_s27 }
  0x14   : > { %p818_p11 = pneg %p1015_p10 }
  0x15   : > { %p837_p7 = por %p836_p5, %p835_p3 }
  0x16   : > { %p830_p13 = pnand %p828_p12, %p818_p11 }
  0x18   : > { %p831_p0 = pneg %p830_p13 }
  0x1a   : > { %p838_p2 = pnand %p837_p7, %p831_p0 }
  0x1c   : > { %841 = shalt.err (!%p838_p2)
}
  0x1d   : > { %s941_s28 = smov 128   ;;  %s942_s29 = smov 8  }
  0x1e   : > { %766 = dma.hbm_to_vmem [thread:$0]  (!%p1015_p10), %s1196_s1, 6144, %s132_s22, [#allocation6], %s941_s28, %s941_s28, %s942_s29  }
  0x1f   : > { %p25_p9 = scmp.eq.s32.totalorder %s24_s26, 0  ;;  %p34_p11 = scmp.ne.s32.totalorder %s934_s14, %s930_s13 }
  0x20   : > { %p35_p12 = scmp.eq.s32.totalorder %s938_s15, 0  ;;  %p776_p2 = scmp.lt.s32.totalorder %s938_s15, 4 }
  0x21   : > { %s1037_s5 = scalar_select %p25_p9, %s934_s14, %s27_s25  }
  0x22   : > { %p36_p13 = por %p35_p12, %p34_p11  ;;  %p1207_p0 = scmp.eq.s32.totalorder %s988_s16, 3 }
  0x23   : > { %s148_s7 = sand.u32 1, %s934_s14   ;;  %s585_s8 = sshll.u32 %s938_s15, 7 }
  0x24   : > { %p1041_p3 = por %p1207_p0, %p34_p11  ;;  %s584_s9 = sshll.u32 %s148_s7, 3 }
  0x25   : > { %s1050_s17 = scalar_lea.hbm %s1195_s0, %s585_s8  ;;  %s152_s21 = scalar_lea.vmem [#allocation2], %s584_s9 }
  0x26   : > { %s1208_s6 = scalar_select %p1041_p3, 1, 0 }
  0x27   : > { %s159_s22 = sshll.u32 %s152_s21, 4  ;;  %p1052_p10 = pnand %p776_p2, %p36_p13  ;;  %s160_s22 = int_to_ptr.vmem [resolvable:$true] %s159_s22 }
  0x28   : > { %s149_s25 = scalar_lea.sflag [#allocation3], %s148_s7  ;;  %s842_s26 = scalar_lea.hbm %s1050_s17, 128 }
  0x29   : > { %p843_p5 = scmp.ne.s32.totalorder %s1050_s17, %s842_s26  ;;  %p844_p7 = pneg %p1052_p10 }
  0x2a   : > { %s847_s29 = scalar_lea.hbm %s1195_s0, 512  ;;  %p848_p12 = scmp.lt.s32.totalorder %s1050_s17, %s1195_s0 }
  0x2b   : > { %p845_p9 = pnand %p844_p7, %p843_p5  ;;  %p849_p2 = scmp.lt.s32.totalorder %s847_s29, %s842_s26 }
  0x2d   : > { %p846_p11 = pneg %p845_p9  ;;  %p850_p13 = por %p849_p2, %p848_p12 }
  0x2f   : > { %p851_p0 = pnand %p850_p13, %p846_p11 }
  0x31   : > { %854 = shalt.err (!%p851_p0)
}
  0x32   : > { %s855_s8 = scalar_lea.vmem %s160_s22, 128  ;;  %s943_s7 = smov [#allocation2]  }
  0x33   : > { %p856_p1 = scmp.ne.s32.totalorder %s160_s22, %s855_s8  ;;  %s860_s9 = sshll.u32 %s943_s7, 4  ;;  %s861_s9 = int_to_ptr.vmem [resolvable:$false] %s860_s9 }
  0x34   : > { %s862_s10 = scalar_lea.vmem %s861_s9, 256  ;;  %p863_p5 = scmp.lt.s32.totalorder %s160_s22, %s861_s9 }
  0x35   : > { %p858_p6 = pnand %p856_p1, %p844_p7  ;;  %p864_p9 = scmp.lt.s32.totalorder %s862_s10, %s855_s8 }
  0x37   : > { %p859_p3 = pneg %p858_p6  ;;  %p865_p4 = por %p864_p9, %p863_p5 }
  0x39   : > { %p866_p8 = pnand %p865_p4, %p859_p3 }
  0x3b   : > { %869 = shalt.err (!%p866_p8)
}
  0x3c   : > { %770 = dma.hbm_to_vmem [thread:$0]  (!%p1052_p10), %s1050_s17, 128, %s160_s22, %s149_s25  }
  0x3d   : > { %p1210_p11 = scmp.ne.s32.totalorder %s1205_s20, 0 }
  0x3e   : > { %s1073_s11 = sand.u32 (!%p1210_p11), 1, %s930_s13   ;;  %p1211_p1 = scmp.ne.s32.totalorder (!%p1210_p11), %s1203_s18, 0 }
  0x3f   : > { %168 = sbr.rel (%p1210_p11) target bundleno = 704 (0x2c0), region = 32  ;;  %s587_s21 = sshll.u32 (!%p1210_p11), %s1073_s11, 3 }
  0x40   : > { %s171_s26 = scalar_lea.sflag (!%p1210_p11), [#allocation3], %s1073_s11  ;;  %s1079_s27 = scalar_lea.vmem (!%p1210_p11), [#allocation2], %s587_s21 }
  0x44   : > { %913 = dma.done.wait (%p1211_p1), %s171_s26, 128  }
  0x45   : > { %915 = vsyncadd (%p1211_p1), %s171_s26, 4294967168  ;;  %p1212_p4 = scmp.eq.s32.totalorder %s988_s16, 0 }
  0x47   : > { %917 = dma.done.wait (%p1212_p4), [#allocation6], 6144   ;;  %p1213_p6 = pmov %p1212_p4 }
  0x48   : > { %v944_v0 = vmov 0.0   ;;  %vm945_vm0 = vmmov 0   ;;  %v217_v1 = vld [vmem:[#allocation5 + $0x78] sm:$0xff]  ;;  %v216_v2 = vld [vmem:[#allocation5 + $0x70] sm:$0xff]  ;;  %v215_v3 = vld [vmem:[#allocation5 + $0x68] sm:$0xff]  ;;  %s596_s28 = sshll.u32 %s988_s16, 7 }
  0x49   : > { %919 = vsyncadd (%p1213_p6), [#allocation6], 4294961152  ;;  %650 = vmatprep.subr.mxu0 %v944_v0  ;;  %682 = vmatprep.mubr.msk.f32.mxu0 %vm945_vm0, %v944_v0  ;;  %v214_v4 = vld [vmem:[#allocation5 + $0x60] sm:$0xff]  ;;  %v311_v5 = vld [vmem:[#allocation5 + $0xf8] sm:$0xff]  ;;  %s200_s29 = scalar_lea.vmem [#allocation7], %s587_s21  ;;  %s1159_s7 = scalar_lea.hbm %s1198_s3, %s596_s28 }
  0x4a   : > { %685 = vmatprep.subr.mxu1 %v944_v0  ;;  %717 = vmatprep.mubr.msk.f32.mxu1 %vm945_vm0, %v944_v0  ;;  %v213_v6 = vld [vmem:[#allocation5 + $0x58] sm:$0xff]  ;;  %v310_v7 = vld [vmem:[#allocation5 + $0xf0] sm:$0xff]  ;;  %v309_v8 = vld [vmem:[#allocation5 + $0xe8] sm:$0xff]  ;;  %s500_s30 = sshll.u32 %s200_s29, 4  ;;  %s487_s9 = scalar_lea.sflag [#allocation4], %s1073_s11  ;;  %s501_s30 = int_to_ptr.vmem [resolvable:$true] %s500_s30 }
  0x4b   : > { %651 = vmatpush3.msra.mxu0 %v217_v1  ;;  %686 = vmatpush3.msra.mxu1 %v311_v5  ;;  %v212_v9 = vld [vmem:[#allocation5 + $0x50] sm:$0xff]  ;;  %v308_v10 = vld [vmem:[#allocation5 + $0xe0] sm:$0xff]  ;;  %v211_v11 = vld [vmem:[#allocation5 + $0x48] sm:$0xff]  ;;  %s870_s10 = scalar_lea.vmem %s501_s30, 128  ;;  %p1214_p3 = scmp.ne.s32.totalorder %s1208_s6, 0 }
  0x4c   : > { %652 = vmatprep.subr.mxu0 %v944_v0  ;;  %687 = vmatprep.subr.mxu1 %v944_v0  ;;  %v307_v12 = vld [vmem:[#allocation5 + $0xd8] sm:$0xff]  ;;  %v210_v13 = vld [vmem:[#allocation5 + $0x40] sm:$0xff]  ;;  %v306_v14 = vld [vmem:[#allocation5 + $0xd0] sm:$0xff]  ;;  %p871_p8 = scmp.ne.s32.totalorder %s501_s30, %s870_s10  ;;  %s946_s16 = smov [#allocation7]  }
  0x4d   : > { %653 = vmatpush3.msra.mxu0 %v216_v2  ;;  %688 = vmatpush3.msra.mxu1 %v310_v7  ;;  %v209_v15 = vld [vmem:[#allocation5 + $0x38] sm:$0xff]  ;;  %v305_v16 = vld [vmem:[#allocation5 + $0xc8] sm:$0xff]  ;;  %v208_v17 = vld [vmem:[#allocation5 + $0x30] sm:$0xff]  ;;  %s874_s26 = sshll.u32 %s946_s16, 4  ;;  %s875_s26 = int_to_ptr.vmem [resolvable:$false] %s874_s26 }
  0x4e   : > { %654 = vmatprep.subr.mxu0 %v944_v0  ;;  %689 = vmatprep.subr.mxu1 %v944_v0  ;;  %v304_v18 = vld [vmem:[#allocation5 + $0xc0] sm:$0xff]  ;;  %v207_v19 = vld [vmem:[#allocation5 + $0x28] sm:$0xff]  ;;  %v303_v20 = vld [vmem:[#allocation5 + $0xb8] sm:$0xff]  ;;  %p872_p10 = pnand %p871_p8, %p1214_p3  ;;  %s876_s21 = scalar_lea.vmem %s875_s26, 256 }
  0x4f   : > { %655 = vmatpush3.msra.mxu0 %v215_v3  ;;  %690 = vmatpush3.msra.mxu1 %v309_v8  ;;  %v206_v21 = vld [vmem:[#allocation5 + $0x20] sm:$0xff]  ;;  %v302_v22 = vld [vmem:[#allocation5 + $0xb0] sm:$0xff]  ;;  %v205_v23 = vld [vmem:[#allocation5 + $0x18] sm:$0xff]  ;;  %p877_p12 = scmp.lt.s32.totalorder %s501_s30, %s875_s26  ;;  %p878_p2 = scmp.lt.s32.totalorder %s876_s21, %s870_s10 }
  0x50   : > { %656 = vmatprep.subr.mxu0 %v944_v0  ;;  %691 = vmatprep.subr.mxu1 %v944_v0  ;;  %v301_v24 = vld [vmem:[#allocation5 + $0xa8] sm:$0xff]  ;;  %v204_v25 = vld [vmem:[#allocation5 + $0x10] sm:$0xff]  ;;  %v300_v26 = vld [vmem:[#allocation5 + $0xa0] sm:$0xff]  ;;  %p873_p7 = pneg %p872_p10 }
  0x51   : > { %657 = vmatpush3.msra.mxu0 %v214_v4  ;;  %692 = vmatpush3.msra.mxu1 %v308_v10  ;;  %v203_v27 = vld [vmem:[#allocation5 + $0x8] sm:$0xff]  ;;  %v299_v28 = vld [vmem:[#allocation5 + $0x98] sm:$0xff]  ;;  %v202_v29 = vld [vmem:[#allocation5] sm:$0xff]  ;;  %p879_p13 = por %p878_p2, %p877_p12 }
  0x52   : > { %658 = vmatprep.subr.mxu0 %v944_v0  ;;  %693 = vmatprep.subr.mxu1 %v944_v0  ;;  %v201_v30 = vld [vmem:[%s1079_s27] sm:$0xff]  ;;  %v297_v32 = vld [vmem:[#allocation5 + $0x88] sm:$0xff]  ;;  %v296_v33 = vld [vmem:[#allocation5 + $0x80] sm:$0xff] }
  0x53   : > { %659 = vmatpush3.msra.mxu0 %v213_v6  ;;  %694 = vmatpush3.msra.mxu1 %v307_v12  ;;  %v298_v31 = vld [vmem:[#allocation5 + $0x90] sm:$0xff]  ;;  %v406_v34 = vld [vmem:[#allocation5 + $0x178] sm:$0xff]  ;;  %v404_v36 = vld [vmem:[#allocation5 + $0x168] sm:$0xff]  ;;  %p880_p0 = pnand %p879_p13, %p873_p7 }
  0x54   : > { %660 = vmatprep.subr.mxu0 %v944_v0  ;;  %695 = vmatprep.subr.mxu1 %v944_v0  ;;  %v405_v35 = vld [vmem:[#allocation5 + $0x170] sm:$0xff]  ;;  %v403_v37 = vld [vmem:[#allocation5 + $0x160] sm:$0xff]  ;;  %v402_v38 = vld [vmem:[#allocation5 + $0x158] sm:$0xff] }
  0x55   : > { %661 = vmatpush3.msra.mxu0 %v212_v9  ;;  %696 = vmatpush3.msra.mxu1 %v306_v14  ;;  %v401_v39 = vld [vmem:[#allocation5 + $0x150] sm:$0xff]  ;;  %v400_v40 = vld [vmem:[#allocation5 + $0x148] sm:$0xff]  ;;  %v399_v41 = vld [vmem:[#allocation5 + $0x140] sm:$0xff] }
  0x56   : > { %662 = vmatprep.subr.mxu0 %v944_v0  ;;  %697 = vmatprep.subr.mxu1 %v944_v0  ;;  %v398_v42 = vld [vmem:[#allocation5 + $0x138] sm:$0xff]  ;;  %v397_v43 = vld [vmem:[#allocation5 + $0x130] sm:$0xff]  ;;  %v396_v44 = vld [vmem:[#allocation5 + $0x128] sm:$0xff] }
  0x57   : > { %663 = vmatpush3.msra.mxu0 %v211_v11  ;;  %698 = vmatpush3.msra.mxu1 %v305_v16  ;;  %v395_v45 = vld [vmem:[#allocation5 + $0x120] sm:$0xff]  ;;  %v394_v46 = vld [vmem:[#allocation5 + $0x118] sm:$0xff]  ;;  %v393_v47 = vld [vmem:[#allocation5 + $0x110] sm:$0xff] }
  0x58   : > { %664 = vmatprep.subr.mxu0 %v944_v0  ;;  %699 = vmatprep.subr.mxu1 %v944_v0  ;;  %v590_v48 = vld [vmem:[%s1197_s2] ss:$0 sm:$0xff]  ;;  %v392_v52 = vld [vmem:[#allocation5 + $0x108] sm:$0xff]  ;;  %v391_v53 = vld [vmem:[#allocation5 + $0x100] sm:$0xff] }
  0x59   : > { %665 = vmatpush3.msra.mxu0 %v210_v13  ;;  %700 = vmatpush3.msra.mxu1 %v304_v18  ;;  %v592_v54 = vld [vmem:[%s1197_s2 + $0x1] ss:$0 sm:$0xff]  ;;  %v594_v58 = vld [vmem:[%s1197_s2 + $0x2] ss:$0 sm:$0xff] }
  0x5a   : > { %666 = vmatprep.subr.mxu0 %v944_v0  ;;  %701 = vmatprep.subr.mxu1 %v944_v0 }
  0x5b   : > { %667 = vmatpush3.msra.mxu0 %v209_v15  ;;  %702 = vmatpush3.msra.mxu1 %v303_v20 }
  0x5c   : > { %668 = vmatprep.subr.mxu0 %v944_v0  ;;  %703 = vmatprep.subr.mxu1 %v944_v0 }
  0x5d   : > { %669 = vmatpush3.msra.mxu0 %v208_v17  ;;  %704 = vmatpush3.msra.mxu1 %v302_v22 }
  0x5e   : > { %670 = vmatprep.subr.mxu0 %v944_v0  ;;  %705 = vmatprep.subr.mxu1 %v944_v0 }
  0x5f   : > { %671 = vmatpush3.msra.mxu0 %v207_v19  ;;  %706 = vmatpush3.msra.mxu1 %v301_v24 }
  0x60   : > { %672 = vmatprep.subr.mxu0 %v944_v0  ;;  %707 = vmatprep.subr.mxu1 %v944_v0 }
  0x61   : > { %673 = vmatpush3.msra.mxu0 %v206_v21  ;;  %708 = vmatpush3.msra.mxu1 %v300_v26 }
  0x62   : > { %674 = vmatprep.subr.mxu0 %v944_v0  ;;  %709 = vmatprep.subr.mxu1 %v944_v0 }
  0x63   : > { %675 = vmatpush3.msra.mxu0 %v205_v23  ;;  %710 = vmatpush3.msra.mxu1 %v299_v28 }
  0x64   : > { %676 = vmatprep.subr.mxu0 %v944_v0  ;;  %711 = vmatprep.subr.mxu1 %v944_v0 }
  0x65   : > { %677 = vmatpush3.msra.mxu0 %v204_v25  ;;  %712 = vmatpush3.msra.mxu1 %v298_v31 }
  0x66   : > { %678 = vmatprep.subr.mxu0 %v944_v0  ;;  %713 = vmatprep.subr.mxu1 %v944_v0 }
  0x67   : > { %679 = vmatpush3.msra.mxu0 %v203_v27  ;;  %714 = vmatpush3.msra.mxu1 %v297_v32 }
  0x68   : > { %680 = vmatprep.subr.mxu0 %v944_v0  ;;  %715 = vmatprep.subr.mxu1 %v944_v0 }
  0x69   : > { %681 = vmatpush3.msra.mxu0 %v202_v29  ;;  %716 = vmatpush3.msra.mxu1 %v296_v33 }
  0x6a   : > { %683 = vmatmul.mubr.f32.vlgmr.msra.gmra.mxu0 %v201_v30  ;;  %720 = vmatprep.subr.mxu0 %v944_v0 }
  0x6b   : > { %752 = vmatprep.mubr.msk.f32.mxu0 %vm945_vm0, %v944_v0  ;;  %721 = vmatpush3.msra.mxu0 %v406_v34 }
  0x6c   : > { %722 = vmatprep.subr.mxu0 %v944_v0 }
  0x6d   : > { %723 = vmatpush3.msra.mxu0 %v405_v35 }
  0x6e   : > { %724 = vmatprep.subr.mxu0 %v944_v0 }
  0x6f   : > { %725 = vmatpush3.msra.mxu0 %v404_v36 }
  0x70   : > { %726 = vmatprep.subr.mxu0 %v944_v0 }
  0x71   : > { %727 = vmatpush3.msra.mxu0 %v403_v37 }
  0x72   : > { %728 = vmatprep.subr.mxu0 %v944_v0 }
  0x73   : > { %729 = vmatpush3.msra.mxu0 %v402_v38 }
  0x74   : > { %730 = vmatprep.subr.mxu0 %v944_v0 }
  0x75   : > { %731 = vmatpush3.msra.mxu0 %v401_v39 }
  0x76   : > { %732 = vmatprep.subr.mxu0 %v944_v0 }
  0x77   : > { %733 = vmatpush3.msra.mxu0 %v400_v40 }
  0x78   : > { %734 = vmatprep.subr.mxu0 %v944_v0 }
  0x79   : > { %735 = vmatpush3.msra.mxu0 %v399_v41 }
  0x7a   : > { %736 = vmatprep.subr.mxu0 %v944_v0 }
  0x7b   : > { %737 = vmatpush3.msra.mxu0 %v398_v42 }
  0x7c   : > { %738 = vmatprep.subr.mxu0 %v944_v0 }
  0x7d   : > { %739 = vmatpush3.msra.mxu0 %v397_v43 }
  0x7e   : > { %740 = vmatprep.subr.mxu0 %v944_v0 }
  0x7f   : > { %741 = vmatpush3.msra.mxu0 %v396_v44 }
  0x80   : > { %742 = vmatprep.subr.mxu0 %v944_v0 }
  0x81   : > { %743 = vmatpush3.msra.mxu0 %v395_v45 }
  0x82   : > { %744 = vmatprep.subr.mxu0 %v944_v0 }
  0x83   : > { %745 = vmatpush3.msra.mxu0 %v394_v46 }
  0x84   : > { %746 = vmatprep.subr.mxu0 %v944_v0 }
  0x85   : > { %747 = vmatpush3.msra.mxu0 %v393_v47 }
  0x86   : > { %748 = vmatprep.subr.mxu0 %v944_v0 }
  0x87   : > { %749 = vmatpush3.msra.mxu0 %v392_v52 }
  0x88   : > { %750 = vmatprep.subr.mxu0 %v944_v0 }
  0x89   : > { %751 = vmatpush3.msra.mxu0 %v391_v53 }
 0x12a   : > { %v291_v49 = vpop.f32.mrf.mxu0 }
 0x12b   : > { %v292_v50 = vadd.f32 %v590_v48, %v291_v49 }
 0x12c   : > { %v684_v51 = vpop.f32.mrf.mxu0 }
 0x12d   : > { %718 = vmatmul.mubr.f32.vlgmr.msra.gmra.mxu1 %v292_v50 }
 0x1ed   : > { %v386_v55 = vpop.f32.mrf.mxu1 }
 0x1ee   : > { %v387_v56 = vadd.f32 %v592_v54, %v386_v55 }
 0x1ef   : > { %v719_v57 = vpop.f32.mrf.mxu1 }
 0x1f0   : > { %753 = vmatmul.mubr.f32.vlgmr.msra.gmra.mxu0 %v387_v56 }
 0x2b0   : > { %v481_v59 = vpop.f32.mrf.mxu0 }
 0x2b1   : > { %v482_v60 = vadd.f32 %v594_v58, %v481_v59 }
 0x2b2   : > { %v754_v61 = vpop.f32.mrf.mxu0 }
 0x2b3   : > { %485 = vst [vmem:[%s200_s29] sm:$0xff] %v482_v60 }
 0x2b4   : > { %883 = shalt.err (!%p880_p0)
}
 0x2b5   : > { %s884_s27 = scalar_lea.hbm %s1159_s7, 128  ;;  %s888_s20 = scalar_lea.hbm %s1198_s3, 512 }
 0x2b6   : > { %p885_p5 = scmp.ne.s32.totalorder %s1159_s7, %s884_s27  ;;  %p889_p1 = scmp.lt.s32.totalorder %s1159_s7, %s1198_s3 }
 0x2b7   : > { %p890_p4 = scmp.lt.s32.totalorder %s888_s20, %s884_s27 }
 0x2b8   : > { %p886_p9 = pnand %p885_p5, %p1214_p3 }
 0x2b9   : > { %p891_p6 = por %p890_p4, %p889_p1 }
 0x2ba   : > { %p887_p11 = pneg %p886_p9 }
 0x2bc   : > { %p892_p8 = pnand %p891_p6, %p887_p11 }
 0x2be   : > { %895 = shalt.err (!%p892_p8)
}
 0x2bf   : > { %761 = dma.vmem_to_hbm [thread:$0]  (%p1214_p3), %s501_s30, 128, %s1159_s7, %s487_s9  }
 0x2c0 PF: > { %p778_p10 = scmp.ge.s32.totalorder %s938_s15, 2  ;;  %s512_s23 = sand.u32 1, %s926_s12  }
 0x2c1   : > { %p1215_p7 = scmp.ne.s32.totalorder %s1204_s19, 0  ;;  %s513_s25 = scalar_lea.sflag [#allocation4], %s512_s23 }
 0x2c3   : > { %p772_p12 = pnand %p778_p10, %p1215_p7 }
 0x2c5   : > { %p773_p2 = pneg %p772_p12 }
 0x2c7   : > { %921 = dma.done.wait (%p773_p2), %s513_s25, 128  }
 0x2c8   : > { %923 = vsyncadd (%p773_p2), %s513_s25, 4294967168  ;;  %p17_p13 = scmp.ge.s32.totalorder %s1020_s24, 6   ;;  %s1216_s12 = smov %s930_s13 }
 0x2c9   : > { %s1217_s13 = smov %s934_s14  ;;  %s1218_s14 = smov %s1037_s5 }
 0x2ca   : > { %s1219_s15 = smov %s1020_s24  ;;  %19 = sbr.rel (!%p17_p13) target bundleno = 6 (0x6), region = 85 }
 0x2cf   :  { %518 = vsyncpa [#allocation3], 1 }
 0x2d0   :  { %520 = vsyncpa [#allocation3 + $0x1], 1 }
 0x2d1   :  { %521 = vsyncpa [#allocation6], 1 }
 0x2d2   :  { %522 = vsyncpa [#allocation4], 1 }
 0x2d3   :  { %524 = vsyncpa [#allocation4 + $0x1], 1 }

</bundles_post_ra>
